<compile_context>
chip_gen: v7x
topology: tpu7x:2x2x1
jax: 0.10.0
libtpu: 0.0.40
codegen_flags: <defaults>
</compile_context>

<pallas_src>
import jax
import jax.numpy as jnp
from jax import lax
from jax.experimental import pallas as pl
from jax.experimental.pallas import tpu as pltpu


def _make_conv_bias_relu_kernel(K, H, W):
    """Builds relu(conv(x) + b) kernel for one batch element (stride 1)."""
    HW = H * W
    # Contract lhs dim 1 (Cin) with rhs dim 1 (Cin): (Cout,Cin) x (HW,Cin)
    # -> (Cout, HW).  Result is channel-major, so no transpose is ever needed.
    NT_DIMS = (((1,), (1,)), ((), ()))

    def kernel(x_ref, w_ref, b_ref, o_ref):
        # x_ref: (1, H+K-1, W+K-1, Cin)  zero-padded NHWC input tile (VMEM)
        # w_ref: (K*K, Cout, Cin)        per-tap weights (VMEM, grid-resident)
        # b_ref: (Cout, 1)               bias column     (VMEM, grid-resident)
        # o_ref: (1, Cout, H*W)          channel-major, lane-dense output
        Cin = x_ref.shape[-1]
        Cout = o_ref.shape[1]

        acc = jnp.zeros((Cout, HW), jnp.float32)
        for kh in range(K):
            for kw in range(K):
                # Static sub-window of the padded tile built in-kernel (this
                # replaces the old HBM im2col).  The (H, W, Cin) -> (H*W, Cin)
                # collapse keeps the minor (Cin) dim unchanged; it is
                # tile-exact when W % 8 == 0 (perf-only concern otherwise).
                tap = x_ref[0, kh:kh + H, kw:kw + W, :].reshape(HW, Cin)
                acc = acc + lax.dot_general(
                    w_ref[kh * K + kw], tap, NT_DIMS,
                    preferred_element_type=jnp.float32)

        out = jnp.maximum(acc + b_ref[...], 0.0)          # fused bias + ReLU (f32)
        o_ref[...] = out[None].astype(o_ref.dtype)        # (1, Cout, H*W), lane-dense

    return kernel


def conv2d_relu_nchw(x_nchw, w_hwio, b, *, kernel_size, padding):
    """relu(conv2d(x, w) + b), stride 1, symmetric zero padding.

    x_nchw: (N, Cin, H, W) f32;  w_hwio: (K, K, Cin, Cout);  b: (Cout,) f32.
    Returns NCHW (N, Cout, Ho, Wo).
    """
    N, Cin, H, W = x_nchw.shape
    K = kernel_size
    Cout = w_hwio.shape[-1]
    Ho = H + 2 * padding - K + 1
    Wo = W + 2 * padding - K + 1
    Hp, Wp = H + 2 * padding, W + 2 * padding

    # Input-side prep: one NCHW->NHWC transpose + spatial zero-pad of the
    # (Cin-narrow, small) input.  This replaces the old 9x-inflated im2col.
    x_pad = jnp.pad(jnp.transpose(x_nchw, (0, 2, 3, 1)),
                    ((0, 0), (padding, padding), (padding, padding), (0, 0)))

    # Per-tap (Cout, Cin) weight matrices; tap order (kh, kw) matches the
    # in-kernel loop.  Bias as a (Cout, 1) column for lane-broadcast.
    w_taps = jnp.transpose(w_hwio, (0, 1, 3, 2)).reshape(K * K, Cout, Cin)
    b_col = b.reshape(Cout, 1)

    # Whole padded image per batch element.  VMEM guard: double-buffered input
    # + resident weights/bias + double-buffered output must stay well inside
    # the smallest scoped-VMEM budget (v5e default 16 MiB; v7x phys 64 MiB).
    blk_bytes = (2 * Hp * Wp * Cin + K * K * Cout * Cin + Cout
                 + 2 * Cout * Ho * Wo) * 4
    assert blk_bytes < 12 * 1024 * 1024, (
        "per-batch block too large for VMEM; add halo row-tiling")
    # TODO(synk): for production H/W where a full image per block overflows
    #             VMEM, tile rows with a (TH + K - 1)-row halo (manual DMA or
    #             pl.Element-indexed blocks) sized from the VMEM budget.

    flops = 2 * N * Ho * Wo * K * K * Cin * Cout
    bytes_accessed = 4 * (x_pad.size + w_taps.size + b_col.size
                          + N * Cout * Ho * Wo)

    out_packed = pl.pallas_call(
        _make_conv_bias_relu_kernel(K, Ho, Wo),
        out_shape=jax.ShapeDtypeStruct((N, Cout, Ho * Wo), x_nchw.dtype),
        grid=(N,),
        in_specs=[
            pl.BlockSpec((1, Hp, Wp, Cin), lambda n: (n, 0, 0, 0)),
            pl.BlockSpec((K * K, Cout, Cin), lambda n: (0, 0, 0)),  # resident
            pl.BlockSpec((Cout, 1), lambda n: (0, 0)),              # resident
        ],
        out_specs=pl.BlockSpec((1, Cout, Ho * Wo), lambda n: (n, 0, 0)),
        compiler_params=pltpu.CompilerParams(
            dimension_semantics=("parallel",)),   # N-axis -> both v7x TCs
        cost_estimate=pl.CostEstimate(flops=flops, transcendentals=0,
                                      bytes_accessed=bytes_accessed),
    )(x_pad, w_taps, b_col)

    # Pure row-major metadata reshape: (N, Cout, Ho*Wo) -> (N, Cout, Ho, Wo).
    # Output is already channel-major, so no wrapper transpose is paid.
    return out_packed.reshape(N, Cout, Ho, Wo)


def init_temporal_branch_params(key, in_channels, channel_size):
    """Deterministic parameter init for the three conv blocks (HWIO)."""
    ks = jax.random.split(key, 6)
    params = {}
    for i, (ksz, kw_key, kb_key) in enumerate(
            [(7, ks[0], ks[1]), (1, ks[2], ks[3]), (3, ks[4], ks[5])], start=1):
        fan_in = in_channels * ksz * ksz
        scale = 1.0 / jnp.sqrt(jnp.float32(fan_in))
        params[f"conv{i}_w"] = scale * jax.random.normal(
            kw_key, (ksz, ksz, in_channels, channel_size), jnp.float32)
        params[f"conv{i}_b"] = scale * jax.random.normal(
            kb_key, (channel_size,), jnp.float32)
    return params


def temporal_branch_forward(params, x_nchw):
    """Mirrors temporal_branch.forward (NCHW in / NCHW out).

    conv1 (7x7) and conv2 (1x1) are computed-then-discarded in the PyTorch
    forward; they cannot affect the return value, so they are elided entirely.
    """
    # TODO(synk): BasicConv2d is not shown in the source snippet; implemented
    #             as a plain biased Conv2d. If it carries training-mode
    #             BatchNorm, fold BN into conv3_w/conv3_b at load time (and
    #             note conv1/conv2 running-stat updates are a training-time
    #             side effect a forward-only kernel cannot reproduce).
    return conv2d_relu_nchw(x_nchw, params["conv3_w"], params["conv3_b"],
                            kernel_size=3, padding=1)


if __name__ == "__main__":
    key = jax.random.PRNGKey(0)
    k_x, k_p = jax.random.split(key)

    N, C_IN, H, W = 2, 4, 16, 16
    CHANNEL_SIZE = 8

    x = jax.random.normal(k_x, (N, C_IN, H, W), jnp.float32)
    params = init_temporal_branch_params(k_p, C_IN, CHANNEL_SIZE)

    fwd = jax.jit(temporal_branch_forward)
    out = jax.block_until_ready(fwd(params, x))

    assert out.shape == (N, CHANNEL_SIZE, H, W), out.shape
    assert bool(jnp.all(out >= 0.0))                    # ReLU output

    # Pure-JAX reference of the only live branch: relu(conv3(x) + b).
    x_nhwc = jnp.transpose(x, (0, 2, 3, 1))
    ref = lax.conv_general_dilated(
        x_nhwc, params["conv3_w"], window_strides=(1, 1),
        padding=((1, 1), (1, 1)),
        dimension_numbers=("NHWC", "HWIO", "NHWC"),
        precision=lax.Precision.HIGHEST)
    ref = jnp.maximum(ref + params["conv3_b"], 0.0)
    ref = jnp.transpose(ref, (0, 3, 1, 2))
    max_err = float(jnp.max(jnp.abs(out - ref)))
    assert bool(jnp.allclose(out, ref, atol=5e-3, rtol=5e-3)), max_err

    print("KERNEL_OK")
</pallas_src>

<mosaic_0001>
module attributes {stable_mosaic.version = 11 : i64} {
  func.func @kernel(%arg0: i32, %arg1: memref<1x18x18x4xf32, #tpu.memory_space<vmem>>, %arg2: memref<9x8x4xf32, #tpu.memory_space<vmem>>, %arg3: memref<8x1xf32, #tpu.memory_space<vmem>>, %arg4: memref<1x8x256xf32, #tpu.memory_space<vmem>>) attributes {dimension_semantics = [#tpu.dimension_semantics<parallel>], iteration_bounds = array<i64: 2>, scalar_prefetch = 0 : i64, scratch_operands = 0 : i64, tpu.core_type = #tpu.core_type<tc>, window_params = [{transform_indices = @transform_0, window_bounds = array<i64: 1, 18, 18, 4>}, {pipeline_mode = #tpu.pipeline_mode<synchronous>, transform_indices = @transform_1, window_bounds = array<i64: 9, 8, 4>}, {pipeline_mode = #tpu.pipeline_mode<synchronous>, transform_indices = @transform_2, window_bounds = array<i64: 8, 1>}, {transform_indices = @transform_3, window_bounds = array<i64: 1, 8, 256>}]} {
    %cst = arith.constant 0.000000e+00 : f32
    %0 = vector.broadcast %cst : f32 to vector<8x256xf32>
    %c0 = arith.constant 0 : index
    %c0_0 = arith.constant 0 : index
    %c0_1 = arith.constant 0 : index
    %c0_2 = arith.constant 0 : index
    %1 = vector.load %arg1[%c0, %c0_0, %c0_1, %c0_2] : memref<1x18x18x4xf32, #tpu.memory_space<vmem>>, vector<1x16x16x4xf32>
    %2 = vector.shape_cast %1 : vector<1x16x16x4xf32> to vector<16x16x4xf32>
    %3 = vector.shape_cast %2 : vector<16x16x4xf32> to vector<256x4xf32>
    %c0_3 = arith.constant 0 : index
    %c0_4 = arith.constant 0 : index
    %c0_5 = arith.constant 0 : index
    %4 = vector.load %arg2[%c0_3, %c0_4, %c0_5] : memref<9x8x4xf32, #tpu.memory_space<vmem>>, vector<1x8x4xf32>
    %5 = vector.shape_cast %4 : vector<1x8x4xf32> to vector<8x4xf32>
    %cst_6 = arith.constant dense<0.000000e+00> : vector<8x256xf32>
    %6 = tpu.matmul %5, %3, %cst_6 {dimension_numbers = #tpu.dot_dimension_numbers<[1], [1], [0], [0], [0, 0, 1, 0], [], []>} : vector<8x4xf32>, vector<256x4xf32>, vector<8x256xf32> -> vector<8x256xf32>
    %7 = arith.addf %0, %6 : vector<8x256xf32>
    %c0_7 = arith.constant 0 : index
    %c0_8 = arith.constant 0 : index
    %c1 = arith.constant 1 : index
    %c0_9 = arith.constant 0 : index
    %8 = vector.load %arg1[%c0_7, %c0_8, %c1, %c0_9] : memref<1x18x18x4xf32, #tpu.memory_space<vmem>>, vector<1x16x16x4xf32>
    %9 = vector.shape_cast %8 : vector<1x16x16x4xf32> to vector<16x16x4xf32>
    %10 = vector.shape_cast %9 : vector<16x16x4xf32> to vector<256x4xf32>
    %c1_10 = arith.constant 1 : index
    %c0_11 = arith.constant 0 : index
    %c0_12 = arith.constant 0 : index
    %11 = vector.load %arg2[%c1_10, %c0_11, %c0_12] : memref<9x8x4xf32, #tpu.memory_space<vmem>>, vector<1x8x4xf32>
    %12 = vector.shape_cast %11 : vector<1x8x4xf32> to vector<8x4xf32>
    %cst_13 = arith.constant dense<0.000000e+00> : vector<8x256xf32>
    %13 = tpu.matmul %12, %10, %cst_13 {dimension_numbers = #tpu.dot_dimension_numbers<[1], [1], [0], [0], [0, 0, 1, 0], [], []>} : vector<8x4xf32>, vector<256x4xf32>, vector<8x256xf32> -> vector<8x256xf32>
    %14 = arith.addf %7, %13 : vector<8x256xf32>
    %c0_14 = arith.constant 0 : index
    %c0_15 = arith.constant 0 : index
    %c2 = arith.constant 2 : index
    %c0_16 = arith.constant 0 : index
    %15 = vector.load %arg1[%c0_14, %c0_15, %c2, %c0_16] : memref<1x18x18x4xf32, #tpu.memory_space<vmem>>, vector<1x16x16x4xf32>
    %16 = vector.shape_cast %15 : vector<1x16x16x4xf32> to vector<16x16x4xf32>
    %17 = vector.shape_cast %16 : vector<16x16x4xf32> to vector<256x4xf32>
    %c2_17 = arith.constant 2 : index
    %c0_18 = arith.constant 0 : index
    %c0_19 = arith.constant 0 : index
    %18 = vector.load %arg2[%c2_17, %c0_18, %c0_19] : memref<9x8x4xf32, #tpu.memory_space<vmem>>, vector<1x8x4xf32>
    %19 = vector.shape_cast %18 : vector<1x8x4xf32> to vector<8x4xf32>
    %cst_20 = arith.constant dense<0.000000e+00> : vector<8x256xf32>
    %20 = tpu.matmul %19, %17, %cst_20 {dimension_numbers = #tpu.dot_dimension_numbers<[1], [1], [0], [0], [0, 0, 1, 0], [], []>} : vector<8x4xf32>, vector<256x4xf32>, vector<8x256xf32> -> vector<8x256xf32>
    %21 = arith.addf %14, %20 : vector<8x256xf32>
    %c0_21 = arith.constant 0 : index
    %c1_22 = arith.constant 1 : index
    %c0_23 = arith.constant 0 : index
    %c0_24 = arith.constant 0 : index
    %22 = vector.load %arg1[%c0_21, %c1_22, %c0_23, %c0_24] : memref<1x18x18x4xf32, #tpu.memory_space<vmem>>, vector<1x16x16x4xf32>
    %23 = vector.shape_cast %22 : vector<1x16x16x4xf32> to vector<16x16x4xf32>
    %24 = vector.shape_cast %23 : vector<16x16x4xf32> to vector<256x4xf32>
    %c3 = arith.constant 3 : index
    %c0_25 = arith.constant 0 : index
    %c0_26 = arith.constant 0 : index
    %25 = vector.load %arg2[%c3, %c0_25, %c0_26] : memref<9x8x4xf32, #tpu.memory_space<vmem>>, vector<1x8x4xf32>
    %26 = vector.shape_cast %25 : vector<1x8x4xf32> to vector<8x4xf32>
    %cst_27 = arith.constant dense<0.000000e+00> : vector<8x256xf32>
    %27 = tpu.matmul %26, %24, %cst_27 {dimension_numbers = #tpu.dot_dimension_numbers<[1], [1], [0], [0], [0, 0, 1, 0], [], []>} : vector<8x4xf32>, vector<256x4xf32>, vector<8x256xf32> -> vector<8x256xf32>
    %28 = arith.addf %21, %27 : vector<8x256xf32>
    %c0_28 = arith.constant 0 : index
    %c1_29 = arith.constant 1 : index
    %c1_30 = arith.constant 1 : index
    %c0_31 = arith.constant 0 : index
    %29 = vector.load %arg1[%c0_28, %c1_29, %c1_30, %c0_31] : memref<1x18x18x4xf32, #tpu.memory_space<vmem>>, vector<1x16x16x4xf32>
    %30 = vector.shape_cast %29 : vector<1x16x16x4xf32> to vector<16x16x4xf32>
    %31 = vector.shape_cast %30 : vector<16x16x4xf32> to vector<256x4xf32>
    %c4 = arith.constant 4 : index
    %c0_32 = arith.constant 0 : index
    %c0_33 = arith.constant 0 : index
    %32 = vector.load %arg2[%c4, %c0_32, %c0_33] : memref<9x8x4xf32, #tpu.memory_space<vmem>>, vector<1x8x4xf32>
    %33 = vector.shape_cast %32 : vector<1x8x4xf32> to vector<8x4xf32>
    %cst_34 = arith.constant dense<0.000000e+00> : vector<8x256xf32>
    %34 = tpu.matmul %33, %31, %cst_34 {dimension_numbers = #tpu.dot_dimension_numbers<[1], [1], [0], [0], [0, 0, 1, 0], [], []>} : vector<8x4xf32>, vector<256x4xf32>, vector<8x256xf32> -> vector<8x256xf32>
    %35 = arith.addf %28, %34 : vector<8x256xf32>
    %c0_35 = arith.constant 0 : index
    %c1_36 = arith.constant 1 : index
    %c2_37 = arith.constant 2 : index
    %c0_38 = arith.constant 0 : index
    %36 = vector.load %arg1[%c0_35, %c1_36, %c2_37, %c0_38] : memref<1x18x18x4xf32, #tpu.memory_space<vmem>>, vector<1x16x16x4xf32>
    %37 = vector.shape_cast %36 : vector<1x16x16x4xf32> to vector<16x16x4xf32>
    %38 = vector.shape_cast %37 : vector<16x16x4xf32> to vector<256x4xf32>
    %c5 = arith.constant 5 : index
    %c0_39 = arith.constant 0 : index
    %c0_40 = arith.constant 0 : index
    %39 = vector.load %arg2[%c5, %c0_39, %c0_40] : memref<9x8x4xf32, #tpu.memory_space<vmem>>, vector<1x8x4xf32>
    %40 = vector.shape_cast %39 : vector<1x8x4xf32> to vector<8x4xf32>
    %cst_41 = arith.constant dense<0.000000e+00> : vector<8x256xf32>
    %41 = tpu.matmul %40, %38, %cst_41 {dimension_numbers = #tpu.dot_dimension_numbers<[1], [1], [0], [0], [0, 0, 1, 0], [], []>} : vector<8x4xf32>, vector<256x4xf32>, vector<8x256xf32> -> vector<8x256xf32>
    %42 = arith.addf %35, %41 : vector<8x256xf32>
    %c0_42 = arith.constant 0 : index
    %c2_43 = arith.constant 2 : index
    %c0_44 = arith.constant 0 : index
    %c0_45 = arith.constant 0 : index
    %43 = vector.load %arg1[%c0_42, %c2_43, %c0_44, %c0_45] : memref<1x18x18x4xf32, #tpu.memory_space<vmem>>, vector<1x16x16x4xf32>
    %44 = vector.shape_cast %43 : vector<1x16x16x4xf32> to vector<16x16x4xf32>
    %45 = vector.shape_cast %44 : vector<16x16x4xf32> to vector<256x4xf32>
    %c6 = arith.constant 6 : index
    %c0_46 = arith.constant 0 : index
    %c0_47 = arith.constant 0 : index
    %46 = vector.load %arg2[%c6, %c0_46, %c0_47] : memref<9x8x4xf32, #tpu.memory_space<vmem>>, vector<1x8x4xf32>
    %47 = vector.shape_cast %46 : vector<1x8x4xf32> to vector<8x4xf32>
    %cst_48 = arith.constant dense<0.000000e+00> : vector<8x256xf32>
    %48 = tpu.matmul %47, %45, %cst_48 {dimension_numbers = #tpu.dot_dimension_numbers<[1], [1], [0], [0], [0, 0, 1, 0], [], []>} : vector<8x4xf32>, vector<256x4xf32>, vector<8x256xf32> -> vector<8x256xf32>
    %49 = arith.addf %42, %48 : vector<8x256xf32>
    %c0_49 = arith.constant 0 : index
    %c2_50 = arith.constant 2 : index
    %c1_51 = arith.constant 1 : index
    %c0_52 = arith.constant 0 : index
    %50 = vector.load %arg1[%c0_49, %c2_50, %c1_51, %c0_52] : memref<1x18x18x4xf32, #tpu.memory_space<vmem>>, vector<1x16x16x4xf32>
    %51 = vector.shape_cast %50 : vector<1x16x16x4xf32> to vector<16x16x4xf32>
    %52 = vector.shape_cast %51 : vector<16x16x4xf32> to vector<256x4xf32>
    %c7 = arith.constant 7 : index
    %c0_53 = arith.constant 0 : index
    %c0_54 = arith.constant 0 : index
    %53 = vector.load %arg2[%c7, %c0_53, %c0_54] : memref<9x8x4xf32, #tpu.memory_space<vmem>>, vector<1x8x4xf32>
    %54 = vector.shape_cast %53 : vector<1x8x4xf32> to vector<8x4xf32>
    %cst_55 = arith.constant dense<0.000000e+00> : vector<8x256xf32>
    %55 = tpu.matmul %54, %52, %cst_55 {dimension_numbers = #tpu.dot_dimension_numbers<[1], [1], [0], [0], [0, 0, 1, 0], [], []>} : vector<8x4xf32>, vector<256x4xf32>, vector<8x256xf32> -> vector<8x256xf32>
    %56 = arith.addf %49, %55 : vector<8x256xf32>
    %c0_56 = arith.constant 0 : index
    %c2_57 = arith.constant 2 : index
    %c2_58 = arith.constant 2 : index
    %c0_59 = arith.constant 0 : index
    %57 = vector.load %arg1[%c0_56, %c2_57, %c2_58, %c0_59] : memref<1x18x18x4xf32, #tpu.memory_space<vmem>>, vector<1x16x16x4xf32>
    %58 = vector.shape_cast %57 : vector<1x16x16x4xf32> to vector<16x16x4xf32>
    %59 = vector.shape_cast %58 : vector<16x16x4xf32> to vector<256x4xf32>
    %c8 = arith.constant 8 : index
    %c0_60 = arith.constant 0 : index
    %c0_61 = arith.constant 0 : index
    %60 = vector.load %arg2[%c8, %c0_60, %c0_61] : memref<9x8x4xf32, #tpu.memory_space<vmem>>, vector<1x8x4xf32>
    %61 = vector.shape_cast %60 : vector<1x8x4xf32> to vector<8x4xf32>
    %cst_62 = arith.constant dense<0.000000e+00> : vector<8x256xf32>
    %62 = tpu.matmul %61, %59, %cst_62 {dimension_numbers = #tpu.dot_dimension_numbers<[1], [1], [0], [0], [0, 0, 1, 0], [], []>} : vector<8x4xf32>, vector<256x4xf32>, vector<8x256xf32> -> vector<8x256xf32>
    %63 = arith.addf %56, %62 : vector<8x256xf32>
    %c0_63 = arith.constant 0 : index
    %c0_64 = arith.constant 0 : index
    %64 = vector.load %arg3[%c0_63, %c0_64] : memref<8x1xf32, #tpu.memory_space<vmem>>, vector<8x1xf32>
    %65 = vector.broadcast %64 : vector<8x1xf32> to vector<8x256xf32>
    %66 = arith.addf %63, %65 : vector<8x256xf32>
    %cst_65 = arith.constant 0.000000e+00 : f32
    %67 = vector.broadcast %cst_65 : f32 to vector<8x256xf32>
    %68 = arith.maximumf %66, %67 : vector<8x256xf32>
    %69 = vector.shape_cast %68 : vector<8x256xf32> to vector<1x8x256xf32>
    %c0_66 = arith.constant 0 : index
    %c0_67 = arith.constant 0 : index
    %c0_68 = arith.constant 0 : index
    %70 = vector.load %arg4[%c0_66, %c0_67, %c0_68] : memref<1x8x256xf32, #tpu.memory_space<vmem>>, vector<1x8x256xf32>
    tpu.vector_store %arg4[%c0_66, %c0_67, %c0_68], %69 {strides = array<i32>} : memref<1x8x256xf32, #tpu.memory_space<vmem>>, vector<1x8x256xf32>,
    return
  }
  func.func @transform_0(%arg0: i32) -> (i32, i32, i32, i32) {
    %c0_i32 = arith.constant 0 : i32
    %c0_i32_0 = arith.constant 0 : i32
    %c0_i32_1 = arith.constant 0 : i32
    %c0_i32_2 = arith.constant 0 : i32
    return %arg0, %c0_i32, %c0_i32_0, %c0_i32_1 : i32, i32, i32, i32
  }
  func.func @transform_1(%arg0: i32) -> (i32, i32, i32) {
    %c0_i32 = arith.constant 0 : i32
    %c0_i32_0 = arith.constant 0 : i32
    %c0_i32_1 = arith.constant 0 : i32
    %c0_i32_2 = arith.constant 0 : i32
    return %c0_i32, %c0_i32_0, %c0_i32_1 : i32, i32, i32
  }
  func.func @transform_2(%arg0: i32) -> (i32, i32) {
    %c0_i32 = arith.constant 0 : i32
    %c0_i32_0 = arith.constant 0 : i32
    %c0_i32_1 = arith.constant 0 : i32
    return %c0_i32, %c0_i32_0 : i32, i32
  }
  func.func @transform_3(%arg0: i32) -> (i32, i32, i32) {
    %c0_i32 = arith.constant 0 : i32
    %c0_i32_0 = arith.constant 0 : i32
    %c0_i32_1 = arith.constant 0 : i32
    return %arg0, %c0_i32, %c0_i32_0 : i32, i32, i32
  }
}

</mosaic_0001>

<bundles_post_ra>
// kernel: temporal_branch_forward.1
= control target key start
LH: loop header
LB: loop body
LE: loop exit
PB: predicated region body
PF: predicated region fallthrough
CT: control target
= control target key end

     0   :  { %s3392_s12 = smov 0   ;;  %s4104_s0 = inlined_call_operand.vmem [shape: f32[2,18,18,4], index: 0, kind: input, shape index: {}]   ;;  %s4105_s1 = inlined_call_operand.vmem [shape: f32[9,8,4], index: 1, kind: input, shape index: {}]   ;;  %s4106_s2 = inlined_call_operand.vmem [shape: f32[8,1], index: 2, kind: input, shape index: {}]   ;;  %s4107_s3 = inlined_call_operand.vmem [shape: f32[2,8,256], index: 3, kind: output, shape index: {}]  }
   0x1 LB: > { %s2090_s13 = sadd.s32 4294967295, %s3369_s12   ;;  %p2094_p0 = scmp.ge.s32.totalorder %s3369_s12, 1  ;;  %s3369_s12 = sphi %s3392_s12, %s13_s12  }
   0x2   : > { %p137_p1 = scmp.lt.s32.totalorder %s3369_s12, 3 }
   0x4   : > { %p138_p2 = pnand %p2094_p0, %p137_p1 }
   0x5   : > { %p161_p3 = scmp.lt.s32.totalorder (!%p138_p2), %s2090_s13, 1  ;;  %vm238_vm0 = vcmask (!%p138_p2), 31744   ;;  %v3403_v0 = vld [vmem:[%s4105_s1 + $0x8] sm:$0xff] (!%p138_p2)  ;;  %v3408_v1 = vld [vmem:[%s4105_s1 + $0x20] sm:$0xff] (!%p138_p2) }
   0x6   : > { %141 = sbr.rel (%p138_p2) target bundleno = 562 (0x232), region = 32  ;;  %2630 = vmatprep.mubr.msk.f32.mxu1 (!%p138_p2), %vm238_vm0, %v3403_v0  ;;  %2766 = vmatprep.mubr.msk.f32.mxu0 (!%p138_p2), %vm238_vm0, %v3408_v1  ;;  %vm3424_vm1 = vmpackc.low (!%p138_p2), %vm238_vm0, %vm238_vm0 }
   0xd   : > { %s4111_s13 = smov (!%p161_p3, %s2090_s13), 1 }
   0xe   : > { %s3352_s18 = smul.u32 432, %s4111_s13  ;;  %s2597_s11 = sshll.u32 %s4111_s13, 4 }
   0xf   : > { %s170_s16 = scalar_lea.vmem %s4107_s3, %s2597_s11 }
  0x10   : > { %s3420_s21 = scalar_lea.vmem %s4104_s0, %s3352_s18 }
  0x11   : > { %v220_v3 = vld [vmem:[%s3420_s21 + $0xc1] sm:$0xff]  ;;  %v221_v4 = vld [vmem:[%s3420_s21 + $0xc9] sm:$0xff]  ;;  %v2281_v5 = vld [vmem:[%s3420_s21 + $0xd9] sm:$0xff] }
  0x12   : > { %v3431_v6 = vpack.c.bf16 %v221_v4, %v220_v3  ;;  %v2282_v7 = vld [vmem:[%s3420_s21 + $0xe1] sm:$0xff]  ;;  %v205_v9 = vld [vmem:[%s3420_s21 + $0x9] sm:$0xff]  ;;  %v2265_v12 = vld [vmem:[%s3420_s21 + $0x19] sm:$0xff] }
  0x13   : > { %v204_v8 = vld [vmem:[%s3420_s21 + $0x1] sm:$0xff]  ;;  %v3096_v10 = vpack.c.bf16 %v2282_v7, %v2281_v5  ;;  %v2283_v14 = vld [vmem:[%s3420_s21 + $0xf1] sm:$0xff]  ;;  %v2284_v16 = vld [vmem:[%s3420_s21 + $0xf9] sm:$0xff] }
  0x14   : > { %v2907_v11 = vpack.c.bf16 %v205_v9, %v204_v8  ;;  %v2266_v13 = vld [vmem:[%s3420_s21 + $0x21] sm:$0xff]  ;;  %2906 = vmatprep.subr.msk.bf16.mxu1 %vm3424_vm1, %v3431_v6  ;;  %v3447_v17 = vpack.c.bf16 %v2284_v16, %v2283_v14  ;;  %v2267_v18 = vld [vmem:[%s3420_s21 + $0x31] sm:$0xff]  ;;  %v2268_v19 = vld [vmem:[%s3420_s21 + $0x39] sm:$0xff] }
  0x15   : > { %v3099_v15 = vpack.c.bf16 %v2266_v13, %v2265_v12  ;;  %3098 = vmatprep.subr.msk.bf16.mxu0 %vm3424_vm1, %v3096_v10  ;;  %v2285_v20 = vld [vmem:[%s3420_s21 + $0x109] sm:$0xff]  ;;  %v2286_v21 = vld [vmem:[%s3420_s21 + $0x111] sm:$0xff]  ;;  %v3460_v22 = vpack.c.bf16 %v2268_v19, %v2267_v18  ;;  %v2287_v26 = vld [vmem:[%s3420_s21 + $0x121] sm:$0xff] }
  0x16   : > { %2909 = vmatpush3.bf16.xpose.msk.msra.mxu1 %vm3424_vm1, %v2907_v11  ;;  %v3462_v23 = vpack.c.bf16 %v2286_v21, %v2285_v20  ;;  %v2269_v24 = vld [vmem:[%s3420_s21 + $0x49] sm:$0xff]  ;;  %v2270_v25 = vld [vmem:[%s3420_s21 + $0x51] sm:$0xff]  ;;  %v2271_v30 = vld [vmem:[%s3420_s21 + $0x61] sm:$0xff] }
  0x17   : > { %3101 = vmatpush3.bf16.xpose.msk.msra.mxu0 %vm3424_vm1, %v3099_v15  ;;  %2912 = vmatprep.subr.msk.bf16.mxu1 %vm3424_vm1, %v3096_v10  ;;  %v2288_v27 = vld [vmem:[%s3420_s21 + $0x129] sm:$0xff]  ;;  %v3479_v28 = vpack.c.bf16 %v2270_v25, %v2269_v24  ;;  %v2289_v32 = vld [vmem:[%s3420_s21 + $0x139] sm:$0xff]  ;;  %v2290_v33 = vld [vmem:[%s3420_s21 + $0x141] sm:$0xff] }
  0x18   : > { %3104 = vmatprep.subr.msk.bf16.mxu0 %vm3424_vm1, %v3447_v17  ;;  %v3481_v29 = vpack.c.bf16 %v2288_v27, %v2287_v26  ;;  %v2272_v31 = vld [vmem:[%s3420_s21 + $0x69] sm:$0xff]  ;;  %v3501_v35 = vpack.c.bf16 %v2290_v33, %v2289_v32  ;;  %v2273_v36 = vld [vmem:[%s3420_s21 + $0x79] sm:$0xff]  ;;  %v2274_v37 = vld [vmem:[%s3420_s21 + $0x81] sm:$0xff] }
  0x19   : > { %v3499_v34 = vpack.c.bf16 %v2272_v31, %v2271_v30  ;;  %v2291_v38 = vld [vmem:[%s3420_s21 + $0x151] sm:$0xff]  ;;  %v2292_v39 = vld [vmem:[%s3420_s21 + $0x159] sm:$0xff]  ;;  %v3519_v40 = vpack.c.bf16 %v2274_v37, %v2273_v36  ;;  %v2293_v44 = vld [vmem:[%s3420_s21 + $0x169] sm:$0xff] }
  0x1a   : > { %v3521_v41 = vpack.c.bf16 %v2292_v39, %v2291_v38  ;;  %v2275_v42 = vld [vmem:[%s3420_s21 + $0x91] sm:$0xff]  ;;  %v2276_v43 = vld [vmem:[%s3420_s21 + $0x99] sm:$0xff]  ;;  %v2277_v48 = vld [vmem:[%s3420_s21 + $0xa9] sm:$0xff] }
  0x1b   : > { %v2294_v45 = vld [vmem:[%s3420_s21 + $0x171] sm:$0xff]  ;;  %v3539_v46 = vpack.c.bf16 %v2276_v43, %v2275_v42  ;;  %v2295_v50 = vld [vmem:[%s3420_s21 + $0x181] sm:$0xff]  ;;  %v2296_v51 = vld [vmem:[%s3420_s21 + $0x189] sm:$0xff] }
  0x1c   : > { %v3541_v47 = vpack.c.bf16 %v2294_v45, %v2293_v44  ;;  %v2278_v49 = vld [vmem:[%s3420_s21 + $0xb1] sm:$0xff]  ;;  %v3561_v53 = vpack.c.bf16 %v2296_v51, %v2295_v50  ;;  %v187_v54 = vld [vmem:[%s3420_s21 + $0xc0] sm:$0xff]  ;;  %v188_v55 = vld [vmem:[%s3420_s21 + $0xc8] sm:$0xff] }
  0x1d   : > { %v3559_v52 = vpack.c.bf16 %v2278_v49, %v2277_v48  ;;  %v2347_v56 = vld [vmem:[%s3420_s21 + $0xda] sm:$0xff]  ;;  %v2348_v57 = vld [vmem:[%s3420_s21 + $0xe2] sm:$0xff]  ;;  %v3579_v58 = vpack.c.bf16 %v188_v55, %v187_v54  ;;  %v2349_v5 = vld [vmem:[%s3420_s21 + $0xf2] sm:$0xff] }
  0x1e   : > { %2915 = vmatpush3.bf16.xpose.msk.msra.mxu1 %vm3424_vm1, %v3099_v15  ;;  %v3581_v59 = vpack.c.bf16 %v2348_v57, %v2347_v56  ;;  %v171_v60 = vld [vmem:[%s3420_s21] sm:$0xff]  ;;  %v172_v61 = vld [vmem:[%s3420_s21 + $0x8] sm:$0xff]  ;;  %v189_v3 = vld [vmem:[%s3420_s21 + $0xd8] sm:$0xff] }
  0x1f   : > { %3107 = vmatpush3.bf16.xpose.msk.msra.mxu0 %vm3424_vm1, %v3460_v22  ;;  %2918 = vmatprep.subr.msk.bf16.mxu1 %vm3424_vm1, %v3447_v17  ;;  %v2331_v62 = vld [vmem:[%s3420_s21 + $0x1a] sm:$0xff]  ;;  %v2332_v63 = vld [vmem:[%s3420_s21 + $0x22] sm:$0xff]  ;;  %v2955_v8 = vpack.c.bf16 %v172_v61, %v171_v60  ;;  %v2333_v15 = vld [vmem:[%s3420_s21 + $0x32] sm:$0xff] }
  0x20   : > { %3110 = vmatprep.subr.msk.bf16.mxu0 %vm3424_vm1, %v3462_v23  ;;  %v190_v4 = vld [vmem:[%s3420_s21 + $0xe0] sm:$0xff]  ;;  %v3603_v9 = vpack.c.bf16 %v2332_v63, %v2331_v62  ;;  %v3623_v13 = vld [vmem:[%s4105_s1 + $0x28] sm:$0xff]  ;;  %v191_v16 = vld [vmem:[%s3420_s21 + $0xf0] sm:$0xff] }
  0x21   : > { %v2350_v7 = vld [vmem:[%s3420_s21 + $0xfa] sm:$0xff]  ;;  %v3605_v10 = vpack.c.bf16 %v190_v4, %v189_v3  ;;  %v2351_v19 = vld [vmem:[%s3420_s21 + $0x10a] sm:$0xff]  ;;  %v2352_v20 = vld [vmem:[%s3420_s21 + $0x112] sm:$0xff] }
  0x22   : > { %v3607_v11 = vpack.c.bf16 %v2350_v7, %v2349_v5  ;;  %v3614_v12 = vld [vmem:[%s4105_s1] sm:$0xff]  ;;  %v192_v18 = vld [vmem:[%s3420_s21 + $0xf8] sm:$0xff]  ;;  %v3652_v26 = vpack.c.bf16 %v2352_v20, %v2351_v19  ;;  %v175_v27 = vld [vmem:[%s3420_s21 + $0x30] sm:$0xff] }
  0x23   : > { %v174_v14 = vld [vmem:[%s3420_s21 + $0x20] sm:$0xff]  ;;  %v3650_v25 = vpack.c.bf16 %v192_v18, %v191_v16  ;;  %v176_v30 = vld [vmem:[%s3420_s21 + $0x38] sm:$0xff]  ;;  %v2335_v31 = vld [vmem:[%s3420_s21 + $0x4a] sm:$0xff] }
  0x24   : > { %v2336_v32 = vld [vmem:[%s3420_s21 + $0x52] sm:$0xff]  ;;  %v193_v33 = vld [vmem:[%s3420_s21 + $0x108] sm:$0xff]  ;;  %v3674_v39 = vpack.c.bf16 %v176_v30, %v175_v27  ;;  %v195_v51 = vld [vmem:[%s3420_s21 + $0x120] sm:$0xff] }
  0x25   : > { %v194_v36 = vld [vmem:[%s3420_s21 + $0x110] sm:$0xff]  ;;  %v2353_v37 = vld [vmem:[%s3420_s21 + $0x122] sm:$0xff]  ;;  %v3676_v42 = vpack.c.bf16 %v2336_v32, %v2335_v31  ;;  %v2355_v55 = vld [vmem:[%s3420_s21 + $0x13a] sm:$0xff] }
  0x26   : > { %2921 = vmatpush3.bf16.xpose.msk.msra.mxu1 %vm3424_vm1, %v3460_v22  ;;  %v2354_v38 = vld [vmem:[%s3420_s21 + $0x12a] sm:$0xff]  ;;  %v3678_v43 = vpack.c.bf16 %v194_v36, %v193_v33  ;;  %v2337_v49 = vld [vmem:[%s3420_s21 + $0x62] sm:$0xff]  ;;  %v2339_v4 = vld [vmem:[%s3420_s21 + $0x7a] sm:$0xff] }
  0x27   : > { %3113 = vmatpush3.bf16.xpose.msk.msra.mxu0 %vm3424_vm1, %v3479_v28  ;;  %2924 = vmatprep.subr.msk.bf16.mxu1 %vm3424_vm1, %v3462_v23  ;;  %v3680_v44 = vpack.c.bf16 %v2354_v38, %v2353_v37  ;;  %v177_v45 = vld [vmem:[%s3420_s21 + $0x48] sm:$0xff]  ;;  %v178_v48 = vld [vmem:[%s3420_s21 + $0x50] sm:$0xff]  ;;  %v179_v63 = vld [vmem:[%s3420_s21 + $0x60] sm:$0xff] }
  0x28   : > { %3116 = vmatprep.subr.msk.bf16.mxu0 %vm3424_vm1, %v3481_v29  ;;  %v2338_v50 = vld [vmem:[%s3420_s21 + $0x6a] sm:$0xff]  ;;  %v2356_v56 = vld [vmem:[%s3420_s21 + $0x142] sm:$0xff]  ;;  %v3702_v57 = vpack.c.bf16 %v178_v48, %v177_v45  ;;  %v197_v7 = vld [vmem:[%s3420_s21 + $0x138] sm:$0xff] }
  0x29   : > { %v196_v54 = vld [vmem:[%s3420_s21 + $0x128] sm:$0xff]  ;;  %v3704_v60 = vpack.c.bf16 %v2338_v50, %v2337_v49  ;;  %v3708_v62 = vpack.c.bf16 %v2356_v56, %v2355_v55  ;;  %v181_v19 = vld [vmem:[%s3420_s21 + $0x78] sm:$0xff]  ;;  %v182_v20 = vld [vmem:[%s3420_s21 + $0x80] sm:$0xff] }
  0x2a   : > { %v3706_v61 = vpack.c.bf16 %v196_v54, %v195_v51  ;;  %v180_v3 = vld [vmem:[%s3420_s21 + $0x68] sm:$0xff]  ;;  %v2341_v27 = vld [vmem:[%s3420_s21 + $0x92] sm:$0xff]  ;;  %v2342_v30 = vld [vmem:[%s3420_s21 + $0x9a] sm:$0xff]  ;;  %v3758_v37 = vpack.c.bf16 %v182_v20, %v181_v19 }
  0x2b   : > { %v2340_v5 = vld [vmem:[%s3420_s21 + $0x82] sm:$0xff]  ;;  %v199_v31 = vld [vmem:[%s3420_s21 + $0x150] sm:$0xff]  ;;  %v200_v32 = vld [vmem:[%s3420_s21 + $0x158] sm:$0xff]  ;;  %v3760_v38 = vpack.c.bf16 %v2342_v30, %v2341_v27 }
  0x2c   : > { %v2359_v33 = vld [vmem:[%s3420_s21 + $0x16a] sm:$0xff]  ;;  %v2360_v36 = vld [vmem:[%s3420_s21 + $0x172] sm:$0xff]  ;;  %v3762_v45 = vpack.c.bf16 %v200_v32, %v199_v31  ;;  %v2345_v19 = vld [vmem:[%s3420_s21 + $0xc2] sm:$0xff] }
  0x2d   : > { %v3764_v48 = vpack.c.bf16 %v2360_v36, %v2359_v33  ;;  %v183_v49 = vld [vmem:[%s3420_s21 + $0x90] sm:$0xff]  ;;  %v184_v50 = vld [vmem:[%s3420_s21 + $0x98] sm:$0xff]  ;;  %v201_v55 = vld [vmem:[%s3420_s21 + $0x168] sm:$0xff] }
  0x2e   : > { %2927 = vmatpush3.bf16.xpose.msk.msra.mxu1 %vm3424_vm1, %v3479_v28  ;;  %v2343_v51 = vld [vmem:[%s3420_s21 + $0xaa] sm:$0xff]  ;;  %v2344_v54 = vld [vmem:[%s3420_s21 + $0xb2] sm:$0xff]  ;;  %v579_v31 = vld [vmem:[%s3420_s21 + $0x2] sm:$0xff] }
  0x2f   : > { %3119 = vmatpush3.bf16.xpose.msk.msra.mxu0 %vm3424_vm1, %v3499_v34  ;;  %2930 = vmatprep.subr.msk.bf16.mxu1 %vm3424_vm1, %v3481_v29  ;;  %v202_v56 = vld [vmem:[%s3420_s21 + $0x170] sm:$0xff] }
  0x30   : > { %3122 = vmatprep.subr.msk.bf16.mxu0 %vm3424_vm1, %v3501_v35  ;;  %v2346_v20 = vld [vmem:[%s3420_s21 + $0xca] sm:$0xff] }
  0x31   : > { %v3812_v30 = vpack.c.bf16 %v2346_v20, %v2345_v19  ;;  %v580_v32 = vld [vmem:[%s3420_s21 + $0xa] sm:$0xff] }
  0x32   : > { %v3003_v33 = vpack.c.bf16 %v580_v32, %v579_v31  ;;  %v2165_v36 = vld [vmem:[%s4105_s1 + $0x10] sm:$0xff] }
  0x36   : > { %2933 = vmatpush3.bf16.xpose.msk.msra.mxu1 %vm3424_vm1, %v3499_v34 }
  0x37   : > { %3125 = vmatpush3.bf16.xpose.msk.msra.mxu0 %vm3424_vm1, %v3519_v40  ;;  %2936 = vmatprep.subr.msk.bf16.mxu1 %vm3424_vm1, %v3501_v35 }
  0x38   : > { %3128 = vmatprep.subr.msk.bf16.mxu0 %vm3424_vm1, %v3521_v41 }
  0x3e   : > { %2939 = vmatpush3.bf16.xpose.msk.msra.mxu1 %vm3424_vm1, %v3519_v40 }
  0x3f   : > { %3131 = vmatpush3.bf16.xpose.msk.msra.mxu0 %vm3424_vm1, %v3539_v46  ;;  %2942 = vmatprep.subr.msk.bf16.mxu1 %vm3424_vm1, %v3521_v41 }
  0x40   : > { %3134 = vmatprep.subr.msk.bf16.mxu0 %vm3424_vm1, %v3541_v47 }
  0x46   : > { %2945 = vmatpush3.bf16.xpose.msk.msra.mxu1 %vm3424_vm1, %v3539_v46 }
  0x47   : > { %3137 = vmatpush3.bf16.xpose.msk.msra.mxu0 %vm3424_vm1, %v3559_v52  ;;  %2948 = vmatprep.subr.msk.bf16.mxu1 %vm3424_vm1, %v3541_v47 }
  0x48   : > { %3140 = vmatprep.subr.msk.bf16.mxu0 %vm3424_vm1, %v3561_v53 }
  0x4e   : > { %2951 = vmatpush3.bf16.xpose.msk.msra.mxu1 %vm3424_vm1, %v3559_v52 }
  0x4f   : > { %3143 = vmatpush3.bf16.xpose.msk.msra.mxu0 %vm3424_vm1, %v3431_v6  ;;  %2954 = vmatprep.subr.msk.bf16.mxu1 %vm3424_vm1, %v3579_v58 }
  0x50   : > { %3146 = vmatprep.subr.msk.bf16.mxu0 %vm3424_vm1, %v3581_v59 }
  0x55   : > { %2631 = vmatmul.mubr.msk.f32.vlgmr.msra.gmra.mrb[0].mxu1 %vm238_vm0, %v3403_v0  ;;  %v173_v0 = vld [vmem:[%s3420_s21 + $0x18] sm:$0xff] }
  0x56   : > { %2957 = vmatpush3.bf16.xpose.msk.msra.mxu1 %vm3424_vm1, %v2955_v8  ;;  %2767 = vmatmul.mubr.msk.f32.vlgmr.msra.gmra.mrb[0].mxu0 %vm238_vm0, %v3408_v1  ;;  %v2334_v1 = vld [vmem:[%s3420_s21 + $0x3a] sm:$0xff]  ;;  %v3646_v21 = vpack.c.bf16 %v174_v14, %v173_v0  ;;  %v2357_v0 = vld [vmem:[%s3420_s21 + $0x152] sm:$0xff] }
  0x57   : > { %3149 = vmatpush3.bf16.xpose.msk.msra.mxu0 %vm3424_vm1, %v3603_v9  ;;  %2960 = vmatprep.subr.msk.bf16.mxu1 %vm3424_vm1, %v3605_v10  ;;  %v3648_v24 = vpack.c.bf16 %v2334_v1, %v2333_v15  ;;  %v198_v8 = vld [vmem:[%s3420_s21 + $0x140] sm:$0xff]  ;;  %v3730_v15 = vpack.c.bf16 %v180_v3, %v179_v63  ;;  %v3732_v1 = vpack.c.bf16 %v2340_v5, %v2339_v4  ;;  %v2362_v3 = vld [vmem:[%s3420_s21 + $0x18a] sm:$0xff] }
  0x58   : > { %3152 = vmatprep.subr.msk.bf16.mxu0 %vm3424_vm1, %v3607_v11  ;;  %2664 = vmatprep.mubr.msk.f32.mxu1 %vm238_vm0, %v3614_v12  ;;  %v2358_v14 = vld [vmem:[%s3420_s21 + $0x15a] sm:$0xff]  ;;  %v3734_v16 = vpack.c.bf16 %v198_v8, %v197_v7  ;;  %v2361_v63 = vld [vmem:[%s3420_s21 + $0x182] sm:$0xff]  ;;  %v3786_v4 = vpack.c.bf16 %v184_v50, %v183_v49  ;;  %v3788_v5 = vpack.c.bf16 %v2344_v54, %v2343_v51  ;;  %v2429_v49 = vld [vmem:[%s4105_s1 + $0x30] sm:$0xff] }
  0x59   : > { %2800 = vmatprep.mubr.msk.f32.mxu0 %vm238_vm0, %v3623_v13  ;;  %v3736_v18 = vpack.c.bf16 %v2358_v14, %v2357_v0  ;;  %v3790_v7 = vpack.c.bf16 %v202_v56, %v201_v55  ;;  %v3792_v8 = vpack.c.bf16 %v2362_v3, %v2361_v63  ;;  %v185_v0 = vld [vmem:[%s3420_s21 + $0xa8] sm:$0xff]  ;;  %v186_v14 = vld [vmem:[%s3420_s21 + $0xb0] sm:$0xff]  ;;  %v2427_v50 = vld [vmem:[%s3420_s21 + $0x198] sm:$0xff] }
  0x5a   : > { %v3810_v27 = vpack.c.bf16 %v186_v14, %v185_v0  ;;  %v2428_v51 = vld [vmem:[%s3420_s21 + $0x1a0] sm:$0xff]  ;;  %v2231_v55 = vld [vmem:[%s4105_s1 + $0x18] sm:$0xff] }
  0x5b   : > { %v3234_v54 = vpack.c.bf16 %v2428_v51, %v2427_v50 }
  0x5e   : > { %2963 = vmatpush3.bf16.xpose.msk.msra.mxu1 %vm3424_vm1, %v3646_v21 }
  0x5f   : > { %3155 = vmatpush3.bf16.xpose.msk.msra.mxu0 %vm3424_vm1, %v3648_v24  ;;  %2966 = vmatprep.subr.msk.bf16.mxu1 %vm3424_vm1, %v3650_v25 }
  0x60   : > { %3158 = vmatprep.subr.msk.bf16.mxu0 %vm3424_vm1, %v3652_v26 }
  0x66   : > { %2969 = vmatpush3.bf16.xpose.msk.msra.mxu1 %vm3424_vm1, %v3674_v39 }
  0x67   : > { %3161 = vmatpush3.bf16.xpose.msk.msra.mxu0 %vm3424_vm1, %v3676_v42  ;;  %2972 = vmatprep.subr.msk.bf16.mxu1 %vm3424_vm1, %v3678_v43 }
  0x68   : > { %3164 = vmatprep.subr.msk.bf16.mxu0 %vm3424_vm1, %v3680_v44 }
  0x6e   : > { %2975 = vmatpush3.bf16.xpose.msk.msra.mxu1 %vm3424_vm1, %v3702_v57 }
  0x6f   : > { %3167 = vmatpush3.bf16.xpose.msk.msra.mxu0 %vm3424_vm1, %v3704_v60  ;;  %2978 = vmatprep.subr.msk.bf16.mxu1 %vm3424_vm1, %v3706_v61 }
  0x70   : > { %3170 = vmatprep.subr.msk.bf16.mxu0 %vm3424_vm1, %v3708_v62 }
  0x76   : > { %2981 = vmatpush3.bf16.xpose.msk.msra.mxu1 %vm3424_vm1, %v3730_v15 }
  0x77   : > { %3173 = vmatpush3.bf16.xpose.msk.msra.mxu0 %vm3424_vm1, %v3732_v1  ;;  %2984 = vmatprep.subr.msk.bf16.mxu1 %vm3424_vm1, %v3734_v16 }
  0x78   : > { %3176 = vmatprep.subr.msk.bf16.mxu0 %vm3424_vm1, %v3736_v18 }
  0x7e   : > { %2987 = vmatpush3.bf16.xpose.msk.msra.mxu1 %vm3424_vm1, %v3758_v37 }
  0x7f   : > { %3179 = vmatpush3.bf16.xpose.msk.msra.mxu0 %vm3424_vm1, %v3760_v38  ;;  %2990 = vmatprep.subr.msk.bf16.mxu1 %vm3424_vm1, %v3762_v45 }
  0x80   : > { %3182 = vmatprep.subr.msk.bf16.mxu0 %vm3424_vm1, %v3764_v48 }
  0x86   : > { %2993 = vmatpush3.bf16.xpose.msk.msra.mxu1 %vm3424_vm1, %v3786_v4 }
  0x87   : > { %3185 = vmatpush3.bf16.xpose.msk.msra.mxu0 %vm3424_vm1, %v3788_v5  ;;  %2996 = vmatprep.subr.msk.bf16.mxu1 %vm3424_vm1, %v3790_v7 }
  0x88   : > { %3188 = vmatprep.subr.msk.bf16.mxu0 %vm3424_vm1, %v3792_v8 }
  0x8e   : > { %2999 = vmatpush3.bf16.xpose.msk.msra.mxu1 %vm3424_vm1, %v3810_v27 }
  0x8f   : > { %3191 = vmatpush3.bf16.xpose.msk.msra.mxu0 %vm3424_vm1, %v3812_v30  ;;  %3002 = vmatprep.subr.msk.bf16.mxu1 %vm3424_vm1, %v3812_v30 }
  0x90   : > { %3194 = vmatprep.subr.msk.bf16.mxu0 %vm3424_vm1, %v3650_v25 }
  0x95   : > { %2665 = vmatmul.mubr.msk.f32.vlgmr.msra.gmra.mrb[0].mxu1 %vm238_vm0, %v3614_v12  ;;  %v2426_v12 = vld [vmem:[%s3420_s21 + $0x188] sm:$0xff] }
  0x96   : > { %3005 = vmatpush3.bf16.xpose.msk.msra.mxu1 %vm3424_vm1, %v3003_v33  ;;  %2801 = vmatmul.mubr.msk.f32.vlgmr.msra.gmra.mrb[0].mxu0 %vm238_vm0, %v3623_v13 }
  0x97   : > { %3197 = vmatpush3.bf16.xpose.msk.msra.mxu0 %vm3424_vm1, %v3674_v39  ;;  %3008 = vmatprep.subr.msk.bf16.mxu1 %vm3424_vm1, %v3581_v59 }
  0x98   : > { %3200 = vmatprep.subr.msk.bf16.mxu0 %vm3424_vm1, %v3678_v43  ;;  %2698 = vmatprep.mubr.msk.f32.mxu1 %vm238_vm0, %v2165_v36 }
  0x99   : > { %2834 = vmatprep.mubr.msk.f32.mxu0 %vm238_vm0, %v2429_v49 }
  0x9e   : > { %3011 = vmatpush3.bf16.xpose.msk.msra.mxu1 %vm3424_vm1, %v3603_v9  ;;  %v2425_v9 = vld [vmem:[%s3420_s21 + $0x180] sm:$0xff] }
  0x9f   : > { %3203 = vmatpush3.bf16.xpose.msk.msra.mxu0 %vm3424_vm1, %v3702_v57  ;;  %3014 = vmatprep.subr.msk.bf16.mxu1 %vm3424_vm1, %v3607_v11  ;;  %v3228_v13 = vpack.c.bf16 %v2426_v12, %v2425_v9 }
  0xa0   : > { %3206 = vmatprep.subr.msk.bf16.mxu0 %vm3424_vm1, %v3706_v61 }
  0xa6   : > { %3017 = vmatpush3.bf16.xpose.msk.msra.mxu1 %vm3424_vm1, %v3648_v24 }
  0xa7   : > { %3209 = vmatpush3.bf16.xpose.msk.msra.mxu0 %vm3424_vm1, %v3730_v15  ;;  %3020 = vmatprep.subr.msk.bf16.mxu1 %vm3424_vm1, %v3652_v26 }
  0xa8   : > { %3212 = vmatprep.subr.msk.bf16.mxu0 %vm3424_vm1, %v3734_v16 }
  0xae   : > { %3023 = vmatpush3.bf16.xpose.msk.msra.mxu1 %vm3424_vm1, %v3676_v42 }
  0xaf   : > { %3215 = vmatpush3.bf16.xpose.msk.msra.mxu0 %vm3424_vm1, %v3758_v37  ;;  %3026 = vmatprep.subr.msk.bf16.mxu1 %vm3424_vm1, %v3680_v44 }
  0xb0   : > { %3218 = vmatprep.subr.msk.bf16.mxu0 %vm3424_vm1, %v3762_v45 }
  0xb6   : > { %3029 = vmatpush3.bf16.xpose.msk.msra.mxu1 %vm3424_vm1, %v3704_v60 }
  0xb7   : > { %3221 = vmatpush3.bf16.xpose.msk.msra.mxu0 %vm3424_vm1, %v3786_v4  ;;  %3032 = vmatprep.subr.msk.bf16.mxu1 %vm3424_vm1, %v3708_v62 }
  0xb8   : > { %3224 = vmatprep.subr.msk.bf16.mxu0 %vm3424_vm1, %v3790_v7 }
  0xbe   : > { %3035 = vmatpush3.bf16.xpose.msk.msra.mxu1 %vm3424_vm1, %v3732_v1 }
  0xbf   : > { %3227 = vmatpush3.bf16.xpose.msk.msra.mxu0 %vm3424_vm1, %v3810_v27  ;;  %3038 = vmatprep.subr.msk.bf16.mxu1 %vm3424_vm1, %v3736_v18 }
  0xc0   : > { %3230 = vmatprep.subr.msk.bf16.mxu0 %vm3424_vm1, %v3228_v13 }
  0xc6   : > { %3041 = vmatpush3.bf16.xpose.msk.msra.mxu1 %vm3424_vm1, %v3760_v38 }
  0xc7   : > { %3233 = vmatpush3.bf16.xpose.msk.msra.mxu0 %vm3424_vm1, %v3579_v58  ;;  %3044 = vmatprep.subr.msk.bf16.mxu1 %vm3424_vm1, %v3764_v48 }
  0xc8   : > { %3236 = vmatprep.subr.msk.bf16.mxu0 %vm3424_vm1, %v3234_v54 }
  0xce   : > { %3047 = vmatpush3.bf16.xpose.msk.msra.mxu1 %vm3424_vm1, %v3788_v5 }
  0xcf   : > { %3239 = vmatpush3.bf16.xpose.msk.msra.mxu0 %vm3424_vm1, %v3605_v10  ;;  %3050 = vmatprep.subr.msk.bf16.mxu1 %vm3424_vm1, %v3605_v10  ;;  %v2495_v10 = vld [vmem:[%s4105_s1 + $0x38] sm:$0xff] }
  0xd0   : > { %3242 = vmatprep.subr.msk.bf16.mxu0 %vm3424_vm1, %v3447_v17  ;;  %v2023_v17 = vld [vmem:[%s4106_s2] sm:$0xff] }
  0xd5   : > { %2699 = vmatmul.mubr.msk.f32.vlgmr.msra.gmra.mrb[0].mxu1 %vm238_vm0, %v2165_v36 }
  0xd6   : > { %3053 = vmatpush3.bf16.xpose.msk.msra.mxu1 %vm3424_vm1, %v3646_v21  ;;  %2835 = vmatmul.mubr.msk.f32.vlgmr.msra.gmra.mrb[0].mxu0 %vm238_vm0, %v2429_v49  ;;  %v3371_v21 = vmov 0  }
  0xd7   : > { %3245 = vmatpush3.bf16.xpose.msk.msra.mxu0 %vm3424_vm1, %v3460_v22  ;;  %3056 = vmatprep.subr.msk.bf16.mxu1 %vm3424_vm1, %v3650_v25  ;;  %v2493_v22 = vld [vmem:[%s3420_s21 + $0x199] sm:$0xff] }
  0xd8   : > { %3248 = vmatprep.subr.msk.bf16.mxu0 %vm3424_vm1, %v3462_v23  ;;  %2732 = vmatprep.mubr.msk.f32.mxu1 %vm238_vm0, %v2231_v55  ;;  %v2494_v23 = vld [vmem:[%s3420_s21 + $0x1a1] sm:$0xff] }
  0xd9   : > { %2868 = vmatprep.mubr.msk.f32.mxu0 %vm238_vm0, %v2495_v10  ;;  %3362 = vset.pattern.permute.xlu0 %v3371_v21 }
  0xda   : > { %2026 = vperm.xlu0 %3362, %v2023_v17  }
  0xde   : > { %3059 = vmatpush3.bf16.xpose.msk.msra.mxu1 %vm3424_vm1, %v3674_v39 }
  0xdf   : > { %3251 = vmatpush3.bf16.xpose.msk.msra.mxu0 %vm3424_vm1, %v3479_v28  ;;  %3062 = vmatprep.subr.msk.bf16.mxu1 %vm3424_vm1, %v3678_v43  ;;  %v3282_v28 = vpack.c.bf16 %v2494_v23, %v2493_v22 }
  0xe0   : > { %3254 = vmatprep.subr.msk.bf16.mxu0 %vm3424_vm1, %v3481_v29  ;;  %v2477_v29 = vld [vmem:[%s3420_s21 + $0xd9] sm:$0xff] }
  0xe6   : > { %3065 = vmatpush3.bf16.xpose.msk.msra.mxu1 %vm3424_vm1, %v3702_v57 }
  0xe7   : > { %3257 = vmatpush3.bf16.xpose.msk.msra.mxu0 %vm3424_vm1, %v3499_v34  ;;  %3068 = vmatprep.subr.msk.bf16.mxu1 %vm3424_vm1, %v3706_v61  ;;  %v2478_v34 = vld [vmem:[%s3420_s21 + $0xe1] sm:$0xff] }
  0xe8   : > { %3260 = vmatprep.subr.msk.bf16.mxu0 %vm3424_vm1, %v3501_v35  ;;  %v3285_v35 = vpack.c.bf16 %v2478_v34, %v2477_v29 }
  0xee   : > { %3071 = vmatpush3.bf16.xpose.msk.msra.mxu1 %vm3424_vm1, %v3730_v15 }
  0xef   : > { %3263 = vmatpush3.bf16.xpose.msk.msra.mxu0 %vm3424_vm1, %v3519_v40  ;;  %3074 = vmatprep.subr.msk.bf16.mxu1 %vm3424_vm1, %v3734_v16  ;;  %v2559_v40 = vld [vmem:[%s3420_s21 + $0x19a] sm:$0xff] }
  0xf0   : > { %3266 = vmatprep.subr.msk.bf16.mxu0 %vm3424_vm1, %v3521_v41  ;;  %v2560_v41 = vld [vmem:[%s3420_s21 + $0x1a2] sm:$0xff] }
  0xf6   : > { %3077 = vmatpush3.bf16.xpose.msk.msra.mxu1 %vm3424_vm1, %v3758_v37 }
  0xf7   : > { %3269 = vmatpush3.bf16.xpose.msk.msra.mxu0 %vm3424_vm1, %v3539_v46  ;;  %3080 = vmatprep.subr.msk.bf16.mxu1 %vm3424_vm1, %v3762_v45  ;;  %v3330_v46 = vpack.c.bf16 %v2560_v41, %v2559_v40 }
  0xf8   : > { %3272 = vmatprep.subr.msk.bf16.mxu0 %vm3424_vm1, %v3541_v47 }
  0xfe   : > { %3083 = vmatpush3.bf16.xpose.msk.msra.mxu1 %vm3424_vm1, %v3786_v4 }
  0xff   : > { %3275 = vmatpush3.bf16.xpose.msk.msra.mxu0 %vm3424_vm1, %v3559_v52  ;;  %3086 = vmatprep.subr.msk.bf16.mxu1 %vm3424_vm1, %v3790_v7 }
 0x100   : > { %3278 = vmatprep.subr.msk.bf16.mxu0 %vm3424_vm1, %v3561_v53 }
 0x106   : > { %3089 = vmatpush3.bf16.xpose.msk.msra.mxu1 %vm3424_vm1, %v3810_v27 }
 0x107   : > { %3281 = vmatpush3.bf16.xpose.msk.msra.mxu0 %vm3424_vm1, %v3431_v6  ;;  %3092 = vmatprep.subr.msk.bf16.mxu1 %vm3424_vm1, %v3228_v13  ;;  %v2561_v6 = vld [vmem:[%s4105_s1 + $0x40] sm:$0xff] }
 0x108   : > { %3284 = vmatprep.subr.msk.bf16.mxu0 %vm3424_vm1, %v3282_v28 }
 0x10e   : > { %3095 = vmatpush3.bf16.xpose.msk.msra.mxu1 %vm3424_vm1, %v3579_v58 }
 0x10f   : > { %3287 = vmatpush3.bf16.xpose.msk.msra.mxu0 %vm3424_vm1, %v3285_v35 }
 0x110   : > { %3290 = vmatprep.subr.msk.bf16.mxu0 %vm3424_vm1, %v3607_v11 }
 0x115   : > { %2733 = vmatmul.mubr.msk.f32.vlgmr.msra.gmra.mrb[0].mxu1 %vm238_vm0, %v2231_v55 }
 0x116   : > { %2869 = vmatmul.mubr.msk.f32.vlgmr.msra.gmra.mrb[0].mxu0 %vm238_vm0, %v2495_v10 }
 0x117   : > { %3293 = vmatpush3.bf16.xpose.msk.msra.mxu0 %vm3424_vm1, %v3648_v24  ;;  %2902 = vmatprep.mubr.msk.f32.mxu0 %vm238_vm0, %v2561_v6 }
 0x118   : > { %3296 = vmatprep.subr.msk.bf16.mxu0 %vm3424_vm1, %v3652_v26 }
 0x11f   : > { %3299 = vmatpush3.bf16.xpose.msk.msra.mxu0 %vm3424_vm1, %v3676_v42 }
 0x120   : > { %3302 = vmatprep.subr.msk.bf16.mxu0 %vm3424_vm1, %v3680_v44 }
 0x127   : > { %3305 = vmatpush3.bf16.xpose.msk.msra.mxu0 %vm3424_vm1, %v3704_v60 }
 0x128   : > { %3308 = vmatprep.subr.msk.bf16.mxu0 %vm3424_vm1, %v3708_v62 }
 0x12f   : > { %3311 = vmatpush3.bf16.xpose.msk.msra.mxu0 %vm3424_vm1, %v3732_v1 }
 0x130   : > { %3314 = vmatprep.subr.msk.bf16.mxu0 %vm3424_vm1, %v3736_v18 }
 0x137   : > { %3317 = vmatpush3.bf16.xpose.msk.msra.mxu0 %vm3424_vm1, %v3760_v38 }
 0x138   : > { %3320 = vmatprep.subr.msk.bf16.mxu0 %vm3424_vm1, %v3764_v48 }
 0x13f   : > { %3323 = vmatpush3.bf16.xpose.msk.msra.mxu0 %vm3424_vm1, %v3788_v5 }
 0x140   : > { %3326 = vmatprep.subr.msk.bf16.mxu0 %vm3424_vm1, %v3792_v8 }
 0x147   : > { %3329 = vmatpush3.bf16.xpose.msk.msra.mxu0 %vm3424_vm1, %v3812_v30 }
 0x148   : > { %3332 = vmatprep.subr.msk.bf16.mxu0 %vm3424_vm1, %v3330_v46 }
 0x14f   : > { %3335 = vmatpush3.bf16.xpose.msk.msra.mxu0 %vm3424_vm1, %v3581_v59 }
 0x156   : > { %2903 = vmatmul.mubr.msk.f32.vlgmr.msra.gmra.mrb[0].mxu0 %vm238_vm0, %v2561_v6 }
 0x159   : > { %v2027_v58 = vpop.permute.xlu0 %2026 }
 0x1e8   : > { %v985_v47 = vpop.f32.mrb[0].mxu1 }
 0x1e9   : > { %v987_v52 = vpop.f32.mrb[1].mxu1 }
 0x229   : > { %v2016_v53 = vpop.f32.mrb[0].mxu0 }
 0x22a   : > { %v3336_v11 = vadd.f32 %v2016_v53, %v985_v47  ;;  %v2018_v24 = vpop.f32.mrb[1].mxu0 }
 0x22b   : > { %v3337_v25 = vadd.f32 %v2018_v24, %v987_v52 }
 0x22c   : > { %v2029_v26 = vadd.f32 %v3336_v11, %v2027_v58 }
 0x22d   : > { %v2030_v39 = vadd.f32 %v3337_v25, %v2027_v58 }
 0x22e   : > { %v2031_v42 = vmax.f32 %v2029_v26, 0.0 }
 0x22f   : > { %v2032_v43 = vmax.f32 %v2030_v39, 0.0 }
 0x230   : > { %2033 = vst [vmem:[%s170_s16] sm:$0xff] %v2031_v42 }
 0x231   : > { %2034 = vst [vmem:[%s170_s16 + $0x8] sm:$0xff] %v2032_v43 }
 0x232 PF: > { %s13_s12 = sadd.s32 1, %s3369_s12  }
 0x233   : > { %p10_p4 = scmp.ge.s32.totalorder %s13_s12, 4  }
 0x235   :  { %12 = sbr.rel (!%p10_p4) target bundleno = 1 (0x1), region = 72 }

</bundles_post_ra>
